<compile_context>
chip_gen: v5e
topology: v5e:2x2
jax: 0.10.0
libtpu: 0.0.40
codegen_flags: <defaults>
</compile_context>

<pallas_src>
import numpy as np

import jax
import jax.numpy as jnp
from jax.experimental import pallas as pl
from jax.experimental.pallas import tpu as pltpu


# ----------------------------------------------------------------------------
# Parameter setup (host-side, once).
# ----------------------------------------------------------------------------
def build_pe_table(d_model: int, max_seq_len: int = 400) -> jnp.ndarray:
    """Vectorized but value-equivalent to the PyTorch __init__ loop:

        pe[pos, i]   = sin(pos / 10000 ** (2 * i / d_model))
        pe[pos, i+1] = cos(pos / 10000 ** (2 * (i + 1) / d_model))
    """
    pos = np.arange(max_seq_len, dtype=np.float64)[:, None]          # (L, 1)
    i = np.arange(0, d_model, 2, dtype=np.float64)[None, :]          # (1, D/2)
    pe = np.zeros((max_seq_len, d_model), dtype=np.float32)
    pe[:, 0::2] = np.sin(pos / 10000.0 ** (2.0 * i / d_model))
    pe[:, 1::2] = np.cos(pos / 10000.0 ** (2.0 * (i + 1.0) / d_model))
    return jnp.asarray(pe)                                           # (L, D)


def make_pe_slab(pe: jnp.ndarray, seq_len: int, d_model: int, dtype) -> jnp.ndarray:
    """Precompute (once, at init) the lane-flattened PE slab in the runtime dtype."""
    return pe[:seq_len].reshape(1, seq_len * d_model).astype(dtype)  # (1, S*D)


# ----------------------------------------------------------------------------
# Kernel body.
# ----------------------------------------------------------------------------
def _pos_enc_kernel(x_ref, pe_ref, o_ref):
    # x_ref / o_ref: (tb, tc) slab for a few batch rows; pe_ref: (1, tc).
    # Rank-matched add; the (1, tc) operand broadcasts along the sublane dim.
    o_ref[...] = x_ref[...] + pe_ref[...]


# ----------------------------------------------------------------------------
# Small hardware / feature probes (cached).
# ----------------------------------------------------------------------------
def _tpu_vmem_capacity_bytes() -> int:
    try:
        return int(pltpu.get_tpu_info().vmem_capacity_bytes)
    except Exception:
        return 64 * 1024 * 1024        # conservative (v7x-sized) fallback


_PE_SINGLE_BUFFER_OK = None


def _pe_single_buffer_supported() -> bool:
    """Probe once whether pipeline_mode=pl.Buffered(1) lowers on this backend."""
    global _PE_SINGLE_BUFFER_OK
    if _PE_SINGLE_BUFFER_OK is None:
        try:
            probe = pl.pallas_call(
                _pos_enc_kernel,
                out_shape=jax.ShapeDtypeStruct((16, 128), jnp.float32),
                grid_spec=pltpu.PrefetchScalarGridSpec(
                    num_scalar_prefetch=0,
                    grid=(1, 2),
                    in_specs=[
                        pl.BlockSpec((8, 128), lambda c, b: (b, c)),
                        pl.BlockSpec((1, 128), lambda c, b: (0, c),
                                     pipeline_mode=pl.Buffered(1)),
                    ],
                    out_specs=pl.BlockSpec((8, 128), lambda c, b: (b, c)),
                ),
            )
            jax.block_until_ready(
                probe(jnp.zeros((16, 128), jnp.float32),
                      jnp.zeros((1, 128), jnp.float32)))
            _PE_SINGLE_BUFFER_OK = True
        except Exception:
            _PE_SINGLE_BUFFER_OK = False
    return _PE_SINGLE_BUFFER_OK


# ----------------------------------------------------------------------------
# Forward pass.
# ----------------------------------------------------------------------------
def positional_encoder(
    x: jnp.ndarray,
    pe_slab: jnp.ndarray,
    *,
    block_bytes: int | None = None,        # target bytes per x/out block
    vmem_limit_bytes: int | None = None,   # scoped-VMEM budget for this call
    alias_input: bool = True,              # write the result back into x's buffer
    split_for_two_cores: bool = True,      # keep both v7x TensorCores busy
) -> jnp.ndarray:
    """x: (B, S, D); pe_slab: (1, S*D) already in x.dtype.  Returns x + pe[:S]."""
    B, S, D = x.shape
    C = S * D
    assert pe_slab.shape == (1, C), "pe_slab must be the (1, S*D) slab for this S/D"
    assert pe_slab.dtype == x.dtype, "pe_slab must be pre-cast to x.dtype"

    itemsize = jnp.dtype(x.dtype).itemsize
    sub = 8 * max(1, 4 // itemsize)        # sublanes per packed vreg: 8/16/32

    vmem_cap = _tpu_vmem_capacity_bytes()
    if vmem_limit_bytes is None:
        # 3/4 of physical VMEM, capped at 96 MiB (v5e/v6e: 128 MiB, v7x: 64 MiB).
        vmem_limit_bytes = min(96 * 1024 * 1024, (vmem_cap * 3) // 4)
    if block_bytes is None:
        # ~8 MiB blocks on 128-MiB-VMEM parts, ~4 MiB on 64-MiB parts; with
        # double-buffered in+out that is ~16-32 MiB scoped VMEM, comfortably
        # inside the budget, and per-step overhead amortizes to <10%.
        block_bytes = (8 if vmem_cap >= 128 * 1024 * 1024 else 4) * 1024 * 1024

    x2 = x.reshape(B, C)                   # free reshape: the add is elementwise

    # ---- Sublane (batch-row) tile: dtype-aware multiple of the vreg packing.
    row_cap = 4 * sub                      # 32 (f32) / 64 (bf16) / 128 (8-bit)
    tb = B if B <= row_cap else row_cap

    # ---- Lane (column) tile: largest multiple of 128 hitting ~block_bytes.
    tc_target = max(128, (block_bytes // max(1, tb * itemsize) // 128) * 128)
    tc = C if C <= tc_target else tc_target

    # ---- Safety clamp: double-buffered in+out (+pe) must fit the scoped budget.
    def _footprint(tb_, tc_):
        return (2 * 2 * tb_ * tc_ + 2 * tc_) * itemsize
    while _footprint(tb, tc) > (vmem_limit_bytes * 85) // 100 and tc > 128:
        tc = max(128, ((tc // 2) // 128) * 128)

    n_col = pl.cdiv(C, tc)
    n_row = pl.cdiv(B, tb)

    # ---- v7x megacore: never hand a non-trivial slab to a (1, 1) grid.
    if (split_for_two_cores and n_col == 1 and n_row == 1
            and C >= 256 and B * C * itemsize >= (1 << 20)):
        half = (C + 1) // 2
        tc = max(128, ((half + 127) // 128) * 128)
        n_col = pl.cdiv(C, tc)

    # ---- PE buffering: single-buffer only when its block index is constant
    # over the whole grid (n_col == 1) — then dropping the second buffer is
    # strictly free; otherwise keep default double-buffering so the column-tile
    # change stays fully overlapped.
    pe_spec_kwargs = {}
    if n_col == 1 and _pe_single_buffer_supported():
        pe_spec_kwargs["pipeline_mode"] = pl.Buffered(1)

    out2 = pl.pallas_call(
        _pos_enc_kernel,
        out_shape=jax.ShapeDtypeStruct((B, C), x.dtype),
        grid_spec=pltpu.PrefetchScalarGridSpec(
            num_scalar_prefetch=0,
            # Column tiles OUTER, batch rows INNER: the pe block index only
            # depends on the outer axis, so pe stays resident across batches.
            grid=(n_col, n_row),
            in_specs=[
                pl.BlockSpec((tb, tc), lambda c, b: (b, c)),                   # x
                pl.BlockSpec((1, tc), lambda c, b: (0, c), **pe_spec_kwargs),  # pe
            ],
            out_specs=pl.BlockSpec((tb, tc), lambda c, b: (b, c)),
        ),
        compiler_params=pltpu.CompilerParams(
            dimension_semantics=("parallel", "parallel"),
            vmem_limit_bytes=int(vmem_limit_bytes),
        ),
        cost_estimate=pl.CostEstimate(
            flops=B * C,
            transcendentals=0,
            bytes_accessed=(2 * B * C + C) * itemsize,
        ),
        # Write the sum back into x's HBM buffer.  In a real model graph, also
        # donate x at the enclosing jit boundary (donate_argnums) so XLA skips
        # the defensive copy; without donation this is still correct.
        input_output_aliases=({0: 0} if alias_input else {}),
    )(x2, pe_slab)

    return out2.reshape(B, S, D)


# ----------------------------------------------------------------------------
# Demo / self-check.
# ----------------------------------------------------------------------------
if __name__ == "__main__":
    # Small shapes consistent with the module: batch=2, seq=8, d_model=32.
    B, S, D = 2, 8, 32
    MAX_SEQ_LEN = 400

    key = jax.random.PRNGKey(0)
    x = jax.random.normal(key, (B, S, D), dtype=jnp.float32)

    pe = build_pe_table(D, MAX_SEQ_LEN)                 # (400, 32) f32, built once
    pe_slab = make_pe_slab(pe, S, D, x.dtype)           # (1, 256), cached at init

    out = positional_encoder(x, pe_slab)
    out = jax.block_until_ready(out)

    # Reference check in plain JAX.
    ref = x + pe[:S][None, :, :].astype(x.dtype)
    assert out.shape == (B, S, D)
    assert jnp.allclose(out, ref, atol=1e-6), "mismatch vs reference"

    print("KERNEL_OK")
</pallas_src>

<mosaic_0001>
module attributes {stable_mosaic.version = 11 : i64} {
  func.func @_pos_enc_kernel(%arg0: i32, %arg1: i32, %arg2: memref<8x128xf32, #tpu.memory_space<vmem>>, %arg3: memref<1x128xf32, #tpu.memory_space<vmem>>, %arg4: memref<8x128xf32, #tpu.memory_space<vmem>>) attributes {dimension_semantics = [#tpu.dimension_semantics<arbitrary>, #tpu.dimension_semantics<arbitrary>], iteration_bounds = array<i64: 1, 2>, scalar_prefetch = 0 : i64, scratch_operands = 0 : i64, tpu.core_type = #tpu.core_type<tc>, window_params = [{transform_indices = @transform_0, window_bounds = array<i64: 8, 128>}, {pipeline_mode = #tpu.pipeline_mode<synchronous>, transform_indices = @transform_1, window_bounds = array<i64: 1, 128>}, {transform_indices = @transform_2, window_bounds = array<i64: 8, 128>}]} {
    %c0 = arith.constant 0 : index
    %c0_0 = arith.constant 0 : index
    %0 = vector.load %arg2[%c0, %c0_0] : memref<8x128xf32, #tpu.memory_space<vmem>>, vector<8x128xf32>
    %c0_1 = arith.constant 0 : index
    %c0_2 = arith.constant 0 : index
    %1 = vector.load %arg3[%c0_1, %c0_2] : memref<1x128xf32, #tpu.memory_space<vmem>>, vector<1x128xf32>
    %2 = vector.broadcast %1 : vector<1x128xf32> to vector<8x128xf32>
    %3 = arith.addf %0, %2 : vector<8x128xf32>
    %c0_3 = arith.constant 0 : index
    %c0_4 = arith.constant 0 : index
    %4 = vector.load %arg4[%c0_3, %c0_4] : memref<8x128xf32, #tpu.memory_space<vmem>>, vector<8x128xf32>
    tpu.vector_store %arg4[%c0_3, %c0_4], %3 {strides = array<i32>} : memref<8x128xf32, #tpu.memory_space<vmem>>, vector<8x128xf32>,
    return
  }
  func.func @transform_0(%arg0: i32, %arg1: i32) -> (i32, i32) {
    %c0_i32 = arith.constant 0 : i32
    return %arg1, %arg0 : i32, i32
  }
  func.func @transform_1(%arg0: i32, %arg1: i32) -> (i32, i32) {
    %c0_i32 = arith.constant 0 : i32
    %c0_i32_0 = arith.constant 0 : i32
    return %c0_i32, %arg0 : i32, i32
  }
  func.func @transform_2(%arg0: i32, %arg1: i32) -> (i32, i32) {
    %c0_i32 = arith.constant 0 : i32
    return %arg1, %arg0 : i32, i32
  }
}

module attributes {stable_mosaic.version = 11 : i64} {
  func.func @_pos_enc_kernel(%arg0: i32, %arg1: i32, %arg2: memref<2x256xf32, #tpu.memory_space<vmem>>, %arg3: memref<1x256xf32, #tpu.memory_space<vmem>>, %arg4: memref<2x256xf32, #tpu.memory_space<vmem>>) attributes {dimension_semantics = [#tpu.dimension_semantics<parallel>, #tpu.dimension_semantics<parallel>], iteration_bounds = array<i64: 1, 1>, scalar_prefetch = 0 : i64, scratch_operands = 0 : i64, tpu.core_type = #tpu.core_type<tc>, window_params = [{transform_indices = @transform_0, window_bounds = array<i64: 2, 256>}, {transform_indices = @transform_1, window_bounds = array<i64: 1, 256>}, {transform_indices = @transform_2, window_bounds = array<i64: 2, 256>}]} {
    %c0 = arith.constant 0 : index
    %c0_0 = arith.constant 0 : index
    %0 = vector.load %arg2[%c0, %c0_0] : memref<2x256xf32, #tpu.memory_space<vmem>>, vector<2x256xf32>
    %c0_1 = arith.constant 0 : index
    %c0_2 = arith.constant 0 : index
    %1 = vector.load %arg3[%c0_1, %c0_2] : memref<1x256xf32, #tpu.memory_space<vmem>>, vector<1x256xf32>
    %2 = vector.broadcast %1 : vector<1x256xf32> to vector<2x256xf32>
    %3 = arith.addf %0, %2 : vector<2x256xf32>
    %c0_3 = arith.constant 0 : index
    %c0_4 = arith.constant 0 : index
    %4 = vector.load %arg4[%c0_3, %c0_4] : memref<2x256xf32, #tpu.memory_space<vmem>>, vector<2x256xf32>
    tpu.vector_store %arg4[%c0_3, %c0_4], %3 {strides = array<i32>} : memref<2x256xf32, #tpu.memory_space<vmem>>, vector<2x256xf32>,
    return
  }
  func.func @transform_0(%arg0: i32, %arg1: i32) -> (i32, i32) {
    %c0_i32 = arith.constant 0 : i32
    return %arg1, %arg0 : i32, i32
  }
  func.func @transform_1(%arg0: i32, %arg1: i32) -> (i32, i32) {
    %c0_i32 = arith.constant 0 : i32
    %c0_i32_0 = arith.constant 0 : i32
    return %c0_i32, %arg0 : i32, i32
  }
  func.func @transform_2(%arg0: i32, %arg1: i32) -> (i32, i32) {
    %c0_i32 = arith.constant 0 : i32
    return %arg1, %arg0 : i32, i32
  }
}

</mosaic_0001>

<bundles_post_ra>
// kernel: tpu_custom_call.1
= control target key start
LH: loop header
LB: loop body
LE: loop exit
PB: predicated region body
PF: predicated region fallthrough
CT: control target
= control target key end

     0   :  { %7 = vsyncpa [#allocation3], 0  ;;  %s716_s0 = inlined_call_operand.hbm [shape: f32[16,128], index: 0, kind: input, shape index: {}]   ;;  %s717_s1 = inlined_call_operand.hbm [shape: f32[1,128], index: 1, kind: input, shape index: {}]   ;;  %s718_s2 = inlined_call_operand.hbm [shape: f32[16,128], index: 2, kind: output, shape index: {}]  }
   0x1   :  { %9 = vsyncpa [#allocation3 + $0x1], 0 }
   0x2   :  { %10 = vsyncpa [#allocation6], 0 }
   0x3   :  { %11 = vsyncpa [#allocation4], 0 }
   0x4   :  { %13 = vsyncpa [#allocation4 + $0x1], 0  ;;  %s567_s9 = smov 0   ;;  %s569_s10 = smov 0  }
   0x5   :  { %s571_s11 = smov 0   ;;  %s573_s12 = smov 0  }
   0x6   :  { %s575_s13 = smov 0   ;;  %s577_s14 = smov 0  }
   0x7 LB: > { %s314_s15 = sadd.s32 4294967295, %s549_s14   ;;  %s315_s16 = sadd.s32 4294967294, %s549_s14   ;;  %s549_s14 = sphi %s577_s14, %s19_s14   ;;  %s545_s13 = sphi %s575_s13, %s730_s13   ;;  %s541_s12 = sphi %s573_s12, %s729_s12   ;;  %s537_s11 = sphi %s571_s11, %s728_s11   ;;  %s533_s10 = sphi %s569_s10, %s727_s10   ;;  %s529_s9 = sphi %s567_s9, %s726_s9  }
   0x8   : > { %p53_p0 = scmp.ne.s32.totalorder %s533_s10, %s529_s9  ;;  %p601_p1 = scmp.eq.s32.totalorder %s314_s15, 0 }
   0x9   : > { %p605_p2 = scmp.eq.s32.totalorder %s314_s15, 1  ;;  %p111_p3 = scmp.eq.s32.totalorder %s315_s16, 1 }
   0xa   : > { %p611_p4 = por %p601_p1, %p53_p0  ;;  %p316_p5 = scmp.ge.s32.totalorder %s549_s14, 1 }
   0xb   : > { %p616_p6 = por %p111_p3, %p53_p0  ;;  %p118_p7 = scmp.lt.s32.totalorder %s549_s14, 3 }
   0xc   : > { %s131_s23 = sshll.u32 %s717_s1, 4  ;;  %p318_p9 = scmp.ge.s32.totalorder %s549_s14, 2  ;;  %s132_s23 = int_to_ptr.hbm [resolvable:$true] %s131_s23 }
   0xd   : > { %p624_p8 = pnand %p316_p5, %p118_p7  ;;  %s551_s25 = smov [#allocation5]  }
   0xe   : > { %s133_s26 = sshll.u32 %s551_s25, 4  ;;  %s28_s27 = sadd.s32 1, %s545_s13  ;;  %s134_s26 = int_to_ptr.vmem [resolvable:$true] %s133_s26 }
   0xf   : > { %p337_p10 = pneg %p624_p8  ;;  %p29_p12 = scmp.ge.s32.totalorder %s28_s27, 2 }
  0x10   : > { %s40_s28 = sadd.s32 1, %s537_s11  ;;  %p47_p13 = scmp.ne.s32.totalorder %s537_s11, %s533_s10 }
  0x11   : > { %p338_p11 = pnand %p337_p10, %p601_p1  ;;  %p48_p0 = scmp.eq.s32.totalorder %s549_s14, 0 }
  0x12   : > { %s732_s27 = smov (%p29_p12, %s28_s27), 0  ;;  %p646_p5 = por %p605_p2, %p47_p13 }
  0x13   : > { %340 = dma.hbm_to_vmem [thread:$0]  (!%p338_p11), %s132_s23, 16, %s134_s26, [#allocation6]  }
  0x14   : > { %p640_p3 = por %p48_p0, %p47_p13  ;;  %s35_s3 = ssub.s32 %s545_s13, %s732_s27 }
  0x15   : > { %p350_p7 = scmp.lt.s32.totalorder %s549_s14, 2  ;;  %p38_p10 = scmp.eq.s32.totalorder %s35_s3, 0 }
  0x16   : > { %s144_s4 = sand.u32 1, %s537_s11   ;;  %s320_s7 = sshll.u32 %s545_s13, 3 }
  0x17   : > { %s319_s5 = sshll.u32 %s144_s4, 3  ;;  %s153_s16 = scalar_lea.hbm %s716_s0, %s320_s7 }
  0x18   : > { %s655_s6 = scalar_select %p38_p10, %s537_s11, %s40_s28  }
  0x19   : > { %s148_s21 = scalar_lea.vmem [#allocation2], %s319_s5  ;;  %s155_s18 = sshll.u32 %s153_s16, 4  ;;  %s156_s18 = int_to_ptr.hbm [resolvable:$true] %s155_s18 }
  0x1a   : > { %s157_s22 = sshll.u32 %s148_s21, 4  ;;  %p342_p2 = pnand %p350_p7, %p640_p3  ;;  %s158_s22 = int_to_ptr.vmem [resolvable:$true] %s157_s22 }
  0x1b   : > { %s145_s23 = scalar_lea.sflag [#allocation3], %s144_s4  ;;  %166 = sbr.rel (%p624_p8) target bundleno = 50 (0x32), region = 28 }
  0x1c   : > { %344 = dma.hbm_to_vmem [thread:$0]  (!%p342_p2), %s156_s18, 128, %s158_s22, %s145_s23  }
  0x1d   : > { %s666_s25 = sand.u32 (!%p624_p8), 1, %s533_s10  }
  0x1e   : > { %s322_s26 = sshll.u32 (!%p624_p8), %s666_s25, 3  ;;  %s169_s28 = scalar_lea.sflag (!%p624_p8), [#allocation3], %s666_s25 }
  0x1f   : > { %s172_s3 = scalar_lea.vmem (!%p624_p8), [#allocation2], %s322_s26 }
  0x20   : > { %516 = dma.done.wait (%p611_p4), %s169_s28, 128  }
  0x21   : > { %518 = vsyncadd (%p611_p4), %s169_s28, 4294967168 }
  0x22   : > { %520 = dma.done.wait (%p601_p1), [#allocation6], 16  }
  0x23   : > { %522 = vsyncadd (%p601_p1), [#allocation6], 4294967280  ;;  %s326_s24 = sshll.u32 %s541_s12, 3  ;;  %s198_s7 = scalar_lea.vmem [#allocation7], %s322_s26  ;;  %v199_v0 = vld [vmem:[%s172_s3] sm:$0xff] }
  0x24   : > { %s218_s5 = scalar_lea.hbm %s718_s2, %s326_s24  ;;  %s220_s8 = sshll.u32 %s198_s7, 4  ;;  %v402_v1 = vld [vmem:[#allocation5] ss:$0 sm:$0xff]  ;;  %s221_s8 = int_to_ptr.vmem [resolvable:$true] %s220_s8 }
  0x25   : > { %s222_s15 = sshll.u32 %s218_s5, 4  ;;  %v204_v2 = vadd.f32 %v402_v1, %v199_v0  ;;  %s207_s19 = scalar_lea.sflag [#allocation4], %s666_s25  ;;  %s223_s15 = int_to_ptr.hbm [resolvable:$true] %s222_s15 }
  0x26   : > { %s477_s17 = sshra.s32 %s223_s15, 4  ;;  %s483_s22 = scalar_lea.hbm %s718_s2, 16  ;;  %s478_s17 = int_to_ptr.hbm [resolvable:$true] %s477_s17 }
  0x27   : > { %205 = vst [vmem:[%s198_s7] sm:$0xff] %v204_v2  ;;  %s479_s16 = scalar_lea.hbm %s478_s17, 8  ;;  %p484_p11 = scmp.lt.s32.totalorder %s478_s17, %s718_s2 }
  0x28   : > { %p480_p1 = scmp.ne.s32.totalorder %s478_s17, %s479_s16  ;;  %p485_p12 = scmp.lt.s32.totalorder %s483_s22, %s479_s16 }
  0x2a   : > { %p481_p4 = pnand %p480_p1, %p646_p5  ;;  %p486_p13 = por %p485_p12, %p484_p11 }
  0x2c   : > { %p482_p8 = pneg %p481_p4 }
  0x2e   : > { %p487_p0 = pnand %p486_p13, %p482_p8 }
  0x30   : > { %490 = shalt.err (!%p487_p0)
}
  0x31   : > { %335 = dma.vmem_to_hbm [thread:$0]  (%p646_p5), %s221_s8, 128, %s223_s15, %s207_s19  }
  0x32 PF: > { %s234_s25 = sand.u32 1, %s529_s9   ;;  %p346_p3 = pnand %p318_p9, %p616_p6 }
  0x33   : > { %s235_s26 = scalar_lea.sflag [#allocation4], %s234_s25 }
  0x34   : > { %p347_p7 = pneg %p346_p3 }
  0x36   : > { %524 = dma.done.wait (%p347_p7), %s235_s26, 128  }
  0x37   : > { %526 = vsyncadd (%p347_p7), %s235_s26, 4294967168  ;;  %s19_s14 = sadd.s32 1, %s549_s14   ;;  %s726_s9 = smov %s533_s10 }
  0x38   : > { %p16_p10 = scmp.ge.s32.totalorder %s19_s14, 4   ;;  %s727_s10 = smov %s537_s11 }
  0x39   : > { %s728_s11 = smov %s655_s6  ;;  %s729_s12 = smov %s545_s13 }
  0x3a   : > { %s730_s13 = smov %s732_s27  ;;  %18 = sbr.rel (!%p16_p10) target bundleno = 7 (0x7), region = 78 }
  0x3f   :  { %241 = vsyncpa [#allocation3], 1 }
  0x40   :  { %243 = vsyncpa [#allocation3 + $0x1], 1 }
  0x41   :  { %244 = vsyncpa [#allocation6], 1 }
  0x42   :  { %245 = vsyncpa [#allocation4], 1 }
  0x43   :  { %247 = vsyncpa [#allocation4 + $0x1], 1 }

// kernel: tpu_custom_call.1
= control target key start
LH: loop header
LB: loop body
LE: loop exit
PB: predicated region body
PF: predicated region fallthrough
CT: control target
= control target key end

     0   :  { %7 = vsyncpa [#allocation3], 0  ;;  %s134_s0 = inlined_call_operand.hbm [shape: f32[2,256], index: 0, kind: input, shape index: {}, may-alias: {0,2}]   ;;  %s135_s1 = inlined_call_operand.vmem [shape: f32[1,256], index: 1, kind: input, shape index: {}]   ;;  %s136_s2 = inlined_call_operand.hbm [shape: f32[2,256], index: 2, kind: output, shape index: {}, may-alias: {0,2}]  }
   0x1   :  { %8 = vsyncpa [#allocation4], 0  ;;  %s14_s11 = sshll.u32 %s134_s0, 4  ;;  %s108_s12 = smov [#allocation2]   ;;  %s15_s11 = int_to_ptr.hbm [resolvable:$true] %s14_s11 }
   0x2   :  { %s16_s13 = sshll.u32 %s108_s12, 4  ;;  %s17_s13 = int_to_ptr.vmem [resolvable:$true] %s16_s13 }
   0x3   :  { %19 = dma.hbm_to_vmem [thread:$0]  %s15_s11, 64, %s17_s13, [#allocation3]  }
   0x4   :  { %104 = dma.done.wait [#allocation3], 64  }
   0x5   :  { %105 = vsyncadd [#allocation3], 4294967232  ;;  %v27_v0 = vld [vmem:[%s135_s1] sm:$0x3]  ;;  %vm32_vm0 = vcmask 1041408   ;;  %s109_s16 = smov [#allocation5]  }
   0x6   :  { %v29_v1 = vperm.slane %v27_v0, 0  ;;  %v30_v2 = vperm.slane %v27_v0, 1  ;;  %v26_v3 = vld [vmem:[#allocation2] sm:$0xf]  ;;  %s42_s17 = sshll.u32 %s109_s16, 4  ;;  %s44_s19 = sshll.u32 %s136_s2, 4  ;;  %s43_s17 = int_to_ptr.vmem [resolvable:$true] %s42_s17  ;;  %s45_s19 = int_to_ptr.hbm [resolvable:$true] %s44_s19 }
   0x8   :  { %v31_v4 = vrot.slane %v30_v2, 6 }
   0xa   :  { %v33_v5 = vsel %vm32_vm0, %v29_v1, %v31_v4 }
   0xb   :  { %v35_v6 = vadd.f32 %v33_v5, %v26_v3 }
   0xd   :  { %36 = vst [vmem:[#allocation5] sm:$0xf] %v35_v6 }
   0xe   :  { %47 = dma.vmem_to_hbm [thread:$0]  %s43_s17, 64, %s45_s19, [#allocation4]  }
   0xf   :  { %106 = dma.done.wait [#allocation4], 64  }
  0x10   :  { %107 = vsyncadd [#allocation4], 4294967232 }
  0x11   :  { %52 = vsyncpa [#allocation3], 1 }
  0x12   :  { %53 = vsyncpa [#allocation4], 1 }

</bundles_post_ra>
